<compile_context>
chip_gen: v7x
topology: tpu7x:2x2x1
jax: 0.10.0
libtpu: 0.0.40
codegen_flags: <defaults>
</compile_context>

<pallas_src>
import functools

import numpy as np
import jax
import jax.numpy as jnp
from jax.experimental import pallas as pl
from jax.experimental.pallas import tpu as pltpu

LANE = 128


# ----------------------------------------------------------------------------
# Pallas kernel
# ----------------------------------------------------------------------------
def _quant_kernel(center_ref, x_ref, *refs, num_centers, temp, soft, noisy):
    """Fused nearest-center quantization + random bit-flip channel.

    center_ref : SMEM (L,)        float32 quantization centers (L == 2**bpe)
    x_ref      : VMEM (tm, 128)   float32 input tile
    flip_ref   : VMEM (tm, 128)   int32   per-element XOR mask (only if noisy)
    w_ref      : VMEM (tm, 128)   float32 quantized (noisy) values
    idx_ref    : VMEM (tm, 128)   float32 noisy center index (float, like torch)
    """
    if noisy:
        flip_ref, w_ref, idx_ref = refs
    else:
        w_ref, idx_ref = refs

    x = x_ref[...]

    # ---- 1. nearest-center index (first-min tie-break, like torch.argmin) ----
    best_d = jnp.abs(x - center_ref[0])
    best_i = jnp.zeros(x.shape, jnp.int32)
    for m in range(1, num_centers):
        d = jnp.abs(x - center_ref[m])
        take = d < best_d
        best_d = jnp.where(take, d, best_d)
        best_i = jnp.where(take, jnp.int32(m), best_i)

    # ---- 2./3. bit-flip channel: encode -> flip -> decode  ==  idx XOR mask --
    if noisy:
        noisy_i = jnp.bitwise_xor(best_i, flip_ref[...])
    else:
        noisy_i = best_i

    # ---- gather noisy centers: small unrolled select chain (pure VPU) --------
    w_noisy = jnp.zeros(x.shape, jnp.float32)
    for m in range(num_centers):
        w_noisy = jnp.where(noisy_i == m, center_ref[m], w_noisy)

    if soft:
        # softmax(-Temp*(x-c)^2) @ centers, stabilised with the max logit.
        mx = -temp * best_d * best_d                    # max_m of the logits
        ssum = jnp.zeros(x.shape, jnp.float32)
        wsum = jnp.zeros(x.shape, jnp.float32)
        for m in range(num_centers):
            dm = x - center_ref[m]
            e = jnp.exp(-temp * dm * dm - mx)
            ssum = ssum + e
            wsum = wsum + e * center_ref[m]
        w_soft = wsum / ssum
        # Straight-through: forward value == W_noisy (W_soft only matters for grads).
        w_ref[...] = w_soft + (w_noisy - w_soft)
    else:
        w_ref[...] = w_noisy
    idx_ref[...] = noisy_i.astype(jnp.float32)


# ----------------------------------------------------------------------------
# Jitted wrapper: layout glue + Bernoulli mask + pallas_call
# ----------------------------------------------------------------------------
@functools.partial(jax.jit, static_argnames=("temp", "ber", "bpe", "soft"))
def _quantize_channel(x, center, seed, *, temp, ber, bpe, soft):
    orig_shape, orig_dtype = x.shape, x.dtype
    xf = x.astype(jnp.float32).reshape(-1)
    total = xf.shape[0]
    num_centers = int(center.shape[0])
    noisy = (float(ber) > 0.0) and (int(bpe) > 0)

    # Lane-dense layout: (rows, 128); rows padded up to a multiple of the tile.
    rows = -(-total // LANE)
    rows8 = ((rows + 7) // 8) * 8
    tm = rows8 if rows8 <= 1024 else 512        # big tiles amortize step overhead
    rows_p = ((rows8 + tm - 1) // tm) * tm
    pad = rows_p * LANE - total
    if pad:
        xf = jnp.pad(xf, (0, pad))
    x2d = xf.reshape(rows_p, LANE)

    center_f = center.astype(jnp.float32)

    tile_spec = pl.BlockSpec((tm, LANE), lambda i: (i, 0))
    in_specs = [
        pl.BlockSpec(memory_space=pltpu.MemorySpace.SMEM),     # centers (L,)
        tile_spec,                                             # x tile
    ]
    inputs = [center_f, x2d]

    if noisy:
        # Exact torch.bernoulli semantics: each of the bpe code bits flips i.i.d.
        # with prob `ber`; the decoded effect is idx XOR mask.
        # TODO(synk): on a real TPU backend this mask could be drawn in-kernel with
        # pltpu.prng_seed/prng_random_bits to avoid the extra HBM stream; the CPU
        # interpret harness does not support that primitive, so it is drawn here.
        key = jax.random.PRNGKey(seed)
        bits = jax.random.bernoulli(key, float(ber), (int(bpe), rows_p, LANE))
        weights = (jnp.int32(1) << jnp.arange(int(bpe), dtype=jnp.int32))[:, None, None]
        flip2d = jnp.sum(bits.astype(jnp.int32) * weights, axis=0).astype(jnp.int32)
        in_specs.append(tile_spec)
        inputs.append(flip2d)

    kern = functools.partial(_quant_kernel, num_centers=num_centers,
                             temp=float(temp), soft=bool(soft), noisy=noisy)
    w2d, idx2d = pl.pallas_call(
        kern,
        out_shape=(jax.ShapeDtypeStruct((rows_p, LANE), jnp.float32),
                   jax.ShapeDtypeStruct((rows_p, LANE), jnp.float32)),
        grid=(rows_p // tm,),
        in_specs=in_specs,
        out_specs=(pl.BlockSpec((tm, LANE), lambda i: (i, 0)),
                   pl.BlockSpec((tm, LANE), lambda i: (i, 0))),
        compiler_params=pltpu.CompilerParams(
            dimension_semantics=("parallel",)),
    )(*inputs)

    w = w2d.reshape(-1)[:total].reshape(orig_shape).astype(orig_dtype)
    idx = idx2d.reshape(-1)[:total].reshape(orig_shape).astype(orig_dtype)
    return w, idx


# ----------------------------------------------------------------------------
# Module wrapper (forward-only port of quantizer_channel)
# ----------------------------------------------------------------------------
class QuantizerChannelPallas:
    """JAX/Pallas port of models.networks.quantizer_channel (forward pass)."""

    def __init__(self, center, Temp, bpe, ber):
        center = jnp.asarray(center, jnp.float32)
        assert center.ndim == 1 and center.shape[0] == 2 ** bpe, \
            "center must hold 2**bpe values"
        self.center = center
        self.Temp = float(Temp)
        self.bpe = int(bpe)
        self.ber = float(ber)
        # MSB-first bitmap, kept for parity with the torch module.  The kernel
        # folds encode -> bit-flip -> decode into a single XOR with a
        # Bernoulli(ber) bit-mask, so the explicit map is not needed at runtime.
        bitmap = np.array([[0], [1]])
        for _ in range(bpe - 1):
            l = bitmap.shape[0]
            upper = np.concatenate((np.zeros((l, 1)), bitmap), axis=1)
            lower = np.concatenate((np.ones((l, 1)), bitmap), axis=1)
            bitmap = np.concatenate((upper, lower), axis=0)
        self.map = jnp.asarray(bitmap, jnp.float32)

    def update_Temp(self, new_temp):
        self.Temp = float(new_temp)

    def update_center(self, new_center):
        self.center = jnp.asarray(new_center, jnp.float32)

    def __call__(self, x, Q_type='None', seed=0):
        if Q_type == 'None':
            return x
        w, idx = _quantize_channel(x, self.center, seed,
                                   temp=self.Temp, ber=self.ber,
                                   bpe=self.bpe, soft=(Q_type == 'Soft'))
        if Q_type == 'Soft':
            return w                    # forward value of the straight-through sum
        return w, idx                   # 'Hard': (quantized value, float index)


# ----------------------------------------------------------------------------
if __name__ == "__main__":
    key = jax.random.PRNGKey(0)

    bpe = 3
    num_centers = 2 ** bpe
    center = jnp.linspace(-1.0, 1.0, num_centers).astype(jnp.float32)

    x = jax.random.normal(key, (2, 4, 16, 16), jnp.float32)

    quant = QuantizerChannelPallas(center, Temp=10.0, bpe=bpe, ber=0.05)

    w_hard, idx = quant(x, Q_type='Hard', seed=0)
    w_soft = quant(x, Q_type='Soft', seed=0)
    ident = quant(x, Q_type='None')
    jax.block_until_ready((w_hard, idx, w_soft))

    # Shape / sanity checks.
    assert w_hard.shape == x.shape and idx.shape == x.shape and w_soft.shape == x.shape
    assert bool(jnp.all(jnp.isfinite(w_hard))) and bool(jnp.all(jnp.isfinite(w_soft)))
    # 'Hard': value is center[noisy_index]; index is a valid float index.
    assert bool(jnp.all((idx >= 0) & (idx <= num_centers - 1)))
    assert bool(jnp.all(jnp.abs(center[idx.astype(jnp.int32)] - w_hard) < 1e-6))
    # 'Soft' forward value equals some center (straight-through to W_noisy).
    d_soft = jnp.min(jnp.abs(w_soft[..., None] - center), axis=-1)
    assert bool(jnp.all(d_soft < 1e-4))
    # 'None' is the identity.
    assert bool(jnp.all(ident == x))

    # Deterministic check: with ber=0 the noisy index must be the exact argmin.
    quant0 = QuantizerChannelPallas(center, Temp=10.0, bpe=bpe, ber=0.0)
    w0, idx0 = quant0(x, Q_type='Hard', seed=123)
    jax.block_until_ready((w0, idx0))
    ref_idx = jnp.argmin(jnp.abs(x[..., None] - center), axis=-1)
    assert bool(jnp.all(idx0.astype(jnp.int32) == ref_idx))
    assert bool(jnp.all(jnp.abs(w0 - center[ref_idx]) < 1e-6))

    print("KERNEL_OK")
</pallas_src>

<mosaic_0001>
module attributes {stable_mosaic.version = 11 : i64} {
  func.func @_quant_kernel(%arg0: i32, %arg1: memref<8xf32, #tpu.memory_space<smem>>, %arg2: memref<16x128xf32, #tpu.memory_space<vmem>>, %arg3: memref<16x128xi32, #tpu.memory_space<vmem>>, %arg4: memref<16x128xf32, #tpu.memory_space<vmem>>, %arg5: memref<16x128xf32, #tpu.memory_space<vmem>>) attributes {dimension_semantics = [#tpu.dimension_semantics<parallel>], iteration_bounds = array<i64: 1>, scalar_prefetch = 0 : i64, scratch_operands = 0 : i64, tpu.core_type = #tpu.core_type<tc>, window_params = [{transform_indices = @transform_0, window_bounds = array<i64: 8>}, {transform_indices = @transform_1, window_bounds = array<i64: 16, 128>}, {transform_indices = @transform_2, window_bounds = array<i64: 16, 128>}, {transform_indices = @transform_3, window_bounds = array<i64: 16, 128>}, {transform_indices = @transform_4, window_bounds = array<i64: 16, 128>}]} {
    %c0 = arith.constant 0 : index
    %c0_0 = arith.constant 0 : index
    %0 = vector.load %arg2[%c0, %c0_0] : memref<16x128xf32, #tpu.memory_space<vmem>>, vector<16x128xf32>
    %c0_1 = arith.constant 0 : index
    %1 = memref.load %arg1[%c0_1] : memref<8xf32, #tpu.memory_space<smem>>
    %2 = vector.broadcast %1 : f32 to vector<16x128xf32>
    %3 = arith.subf %0, %2 : vector<16x128xf32>
    %4 = math.absf %3 : vector<16x128xf32>
    %c0_i32 = arith.constant 0 : i32
    %5 = vector.broadcast %c0_i32 : i32 to vector<16x128xi32>
    %c1 = arith.constant 1 : index
    %6 = memref.load %arg1[%c1] : memref<8xf32, #tpu.memory_space<smem>>
    %7 = vector.broadcast %6 : f32 to vector<16x128xf32>
    %8 = arith.subf %0, %7 : vector<16x128xf32>
    %9 = math.absf %8 : vector<16x128xf32>
    %10 = arith.cmpf olt, %9, %4 : vector<16x128xf32>
    %11 = arith.select %10, %9, %4 : vector<16x128xi1>, vector<16x128xf32>
    %c1_i32 = arith.constant 1 : i32
    %12 = vector.broadcast %c1_i32 : i32 to vector<16x128xi32>
    %13 = arith.select %10, %12, %5 : vector<16x128xi1>, vector<16x128xi32>
    %c2 = arith.constant 2 : index
    %14 = memref.load %arg1[%c2] : memref<8xf32, #tpu.memory_space<smem>>
    %15 = vector.broadcast %14 : f32 to vector<16x128xf32>
    %16 = arith.subf %0, %15 : vector<16x128xf32>
    %17 = math.absf %16 : vector<16x128xf32>
    %18 = arith.cmpf olt, %17, %11 : vector<16x128xf32>
    %19 = arith.select %18, %17, %11 : vector<16x128xi1>, vector<16x128xf32>
    %c2_i32 = arith.constant 2 : i32
    %20 = vector.broadcast %c2_i32 : i32 to vector<16x128xi32>
    %21 = arith.select %18, %20, %13 : vector<16x128xi1>, vector<16x128xi32>
    %c3 = arith.constant 3 : index
    %22 = memref.load %arg1[%c3] : memref<8xf32, #tpu.memory_space<smem>>
    %23 = vector.broadcast %22 : f32 to vector<16x128xf32>
    %24 = arith.subf %0, %23 : vector<16x128xf32>
    %25 = math.absf %24 : vector<16x128xf32>
    %26 = arith.cmpf olt, %25, %19 : vector<16x128xf32>
    %27 = arith.select %26, %25, %19 : vector<16x128xi1>, vector<16x128xf32>
    %c3_i32 = arith.constant 3 : i32
    %28 = vector.broadcast %c3_i32 : i32 to vector<16x128xi32>
    %29 = arith.select %26, %28, %21 : vector<16x128xi1>, vector<16x128xi32>
    %c4 = arith.constant 4 : index
    %30 = memref.load %arg1[%c4] : memref<8xf32, #tpu.memory_space<smem>>
    %31 = vector.broadcast %30 : f32 to vector<16x128xf32>
    %32 = arith.subf %0, %31 : vector<16x128xf32>
    %33 = math.absf %32 : vector<16x128xf32>
    %34 = arith.cmpf olt, %33, %27 : vector<16x128xf32>
    %35 = arith.select %34, %33, %27 : vector<16x128xi1>, vector<16x128xf32>
    %c4_i32 = arith.constant 4 : i32
    %36 = vector.broadcast %c4_i32 : i32 to vector<16x128xi32>
    %37 = arith.select %34, %36, %29 : vector<16x128xi1>, vector<16x128xi32>
    %c5 = arith.constant 5 : index
    %38 = memref.load %arg1[%c5] : memref<8xf32, #tpu.memory_space<smem>>
    %39 = vector.broadcast %38 : f32 to vector<16x128xf32>
    %40 = arith.subf %0, %39 : vector<16x128xf32>
    %41 = math.absf %40 : vector<16x128xf32>
    %42 = arith.cmpf olt, %41, %35 : vector<16x128xf32>
    %43 = arith.select %42, %41, %35 : vector<16x128xi1>, vector<16x128xf32>
    %c5_i32 = arith.constant 5 : i32
    %44 = vector.broadcast %c5_i32 : i32 to vector<16x128xi32>
    %45 = arith.select %42, %44, %37 : vector<16x128xi1>, vector<16x128xi32>
    %c6 = arith.constant 6 : index
    %46 = memref.load %arg1[%c6] : memref<8xf32, #tpu.memory_space<smem>>
    %47 = vector.broadcast %46 : f32 to vector<16x128xf32>
    %48 = arith.subf %0, %47 : vector<16x128xf32>
    %49 = math.absf %48 : vector<16x128xf32>
    %50 = arith.cmpf olt, %49, %43 : vector<16x128xf32>
    %51 = arith.select %50, %49, %43 : vector<16x128xi1>, vector<16x128xf32>
    %c6_i32 = arith.constant 6 : i32
    %52 = vector.broadcast %c6_i32 : i32 to vector<16x128xi32>
    %53 = arith.select %50, %52, %45 : vector<16x128xi1>, vector<16x128xi32>
    %c7 = arith.constant 7 : index
    %54 = memref.load %arg1[%c7] : memref<8xf32, #tpu.memory_space<smem>>
    %55 = vector.broadcast %54 : f32 to vector<16x128xf32>
    %56 = arith.subf %0, %55 : vector<16x128xf32>
    %57 = math.absf %56 : vector<16x128xf32>
    %58 = arith.cmpf olt, %57, %51 : vector<16x128xf32>
    %c7_i32 = arith.constant 7 : i32
    %59 = vector.broadcast %c7_i32 : i32 to vector<16x128xi32>
    %60 = arith.select %58, %59, %53 : vector<16x128xi1>, vector<16x128xi32>
    %c0_2 = arith.constant 0 : index
    %c0_3 = arith.constant 0 : index
    %61 = vector.load %arg3[%c0_2, %c0_3] : memref<16x128xi32, #tpu.memory_space<vmem>>, vector<16x128xi32>
    %62 = arith.xori %60, %61 : vector<16x128xi32>
    %cst = arith.constant 0.000000e+00 : f32
    %63 = vector.broadcast %cst : f32 to vector<16x128xf32>
    %c0_i32_4 = arith.constant 0 : i32
    %64 = vector.broadcast %c0_i32_4 : i32 to vector<16x128xi32>
    %65 = arith.cmpi eq, %62, %64 : vector<16x128xi32>
    %c0_5 = arith.constant 0 : index
    %66 = memref.load %arg1[%c0_5] : memref<8xf32, #tpu.memory_space<smem>>
    %67 = vector.broadcast %66 : f32 to vector<16x128xf32>
    %68 = arith.select %65, %67, %63 : vector<16x128xi1>, vector<16x128xf32>
    %c1_i32_6 = arith.constant 1 : i32
    %69 = vector.broadcast %c1_i32_6 : i32 to vector<16x128xi32>
    %70 = arith.cmpi eq, %62, %69 : vector<16x128xi32>
    %c1_7 = arith.constant 1 : index
    %71 = memref.load %arg1[%c1_7] : memref<8xf32, #tpu.memory_space<smem>>
    %72 = vector.broadcast %71 : f32 to vector<16x128xf32>
    %73 = arith.select %70, %72, %68 : vector<16x128xi1>, vector<16x128xf32>
    %c2_i32_8 = arith.constant 2 : i32
    %74 = vector.broadcast %c2_i32_8 : i32 to vector<16x128xi32>
    %75 = arith.cmpi eq, %62, %74 : vector<16x128xi32>
    %c2_9 = arith.constant 2 : index
    %76 = memref.load %arg1[%c2_9] : memref<8xf32, #tpu.memory_space<smem>>
    %77 = vector.broadcast %76 : f32 to vector<16x128xf32>
    %78 = arith.select %75, %77, %73 : vector<16x128xi1>, vector<16x128xf32>
    %c3_i32_10 = arith.constant 3 : i32
    %79 = vector.broadcast %c3_i32_10 : i32 to vector<16x128xi32>
    %80 = arith.cmpi eq, %62, %79 : vector<16x128xi32>
    %c3_11 = arith.constant 3 : index
    %81 = memref.load %arg1[%c3_11] : memref<8xf32, #tpu.memory_space<smem>>
    %82 = vector.broadcast %81 : f32 to vector<16x128xf32>
    %83 = arith.select %80, %82, %78 : vector<16x128xi1>, vector<16x128xf32>
    %c4_i32_12 = arith.constant 4 : i32
    %84 = vector.broadcast %c4_i32_12 : i32 to vector<16x128xi32>
    %85 = arith.cmpi eq, %62, %84 : vector<16x128xi32>
    %c4_13 = arith.constant 4 : index
    %86 = memref.load %arg1[%c4_13] : memref<8xf32, #tpu.memory_space<smem>>
    %87 = vector.broadcast %86 : f32 to vector<16x128xf32>
    %88 = arith.select %85, %87, %83 : vector<16x128xi1>, vector<16x128xf32>
    %c5_i32_14 = arith.constant 5 : i32
    %89 = vector.broadcast %c5_i32_14 : i32 to vector<16x128xi32>
    %90 = arith.cmpi eq, %62, %89 : vector<16x128xi32>
    %c5_15 = arith.constant 5 : index
    %91 = memref.load %arg1[%c5_15] : memref<8xf32, #tpu.memory_space<smem>>
    %92 = vector.broadcast %91 : f32 to vector<16x128xf32>
    %93 = arith.select %90, %92, %88 : vector<16x128xi1>, vector<16x128xf32>
    %c6_i32_16 = arith.constant 6 : i32
    %94 = vector.broadcast %c6_i32_16 : i32 to vector<16x128xi32>
    %95 = arith.cmpi eq, %62, %94 : vector<16x128xi32>
    %c6_17 = arith.constant 6 : index
    %96 = memref.load %arg1[%c6_17] : memref<8xf32, #tpu.memory_space<smem>>
    %97 = vector.broadcast %96 : f32 to vector<16x128xf32>
    %98 = arith.select %95, %97, %93 : vector<16x128xi1>, vector<16x128xf32>
    %c7_i32_18 = arith.constant 7 : i32
    %99 = vector.broadcast %c7_i32_18 : i32 to vector<16x128xi32>
    %100 = arith.cmpi eq, %62, %99 : vector<16x128xi32>
    %c7_19 = arith.constant 7 : index
    %101 = memref.load %arg1[%c7_19] : memref<8xf32, #tpu.memory_space<smem>>
    %102 = vector.broadcast %101 : f32 to vector<16x128xf32>
    %103 = arith.select %100, %102, %98 : vector<16x128xi1>, vector<16x128xf32>
    %c0_20 = arith.constant 0 : index
    %c0_21 = arith.constant 0 : index
    %104 = vector.load %arg4[%c0_20, %c0_21] : memref<16x128xf32, #tpu.memory_space<vmem>>, vector<16x128xf32>
    tpu.vector_store %arg4[%c0_20, %c0_21], %103 {strides = array<i32>} : memref<16x128xf32, #tpu.memory_space<vmem>>, vector<16x128xf32>,
    %105 = arith.sitofp %62 : vector<16x128xi32> to vector<16x128xf32>
    %c0_22 = arith.constant 0 : index
    %c0_23 = arith.constant 0 : index
    %106 = vector.load %arg5[%c0_22, %c0_23] : memref<16x128xf32, #tpu.memory_space<vmem>>, vector<16x128xf32>
    tpu.vector_store %arg5[%c0_22, %c0_23], %105 {strides = array<i32>} : memref<16x128xf32, #tpu.memory_space<vmem>>, vector<16x128xf32>,
    return
  }
  func.func @transform_0(%arg0: i32) -> i32 {
    %c0_i32 = arith.constant 0 : i32
    %c0_i32_0 = arith.constant 0 : i32
    return %c0_i32 : i32
  }
  func.func @transform_1(%arg0: i32) -> (i32, i32) {
    %c0_i32 = arith.constant 0 : i32
    %c0_i32_0 = arith.constant 0 : i32
    return %arg0, %c0_i32 : i32, i32
  }
  func.func @transform_2(%arg0: i32) -> (i32, i32) {
    %c0_i32 = arith.constant 0 : i32
    %c0_i32_0 = arith.constant 0 : i32
    return %arg0, %c0_i32 : i32, i32
  }
  func.func @transform_3(%arg0: i32) -> (i32, i32) {
    %c0_i32 = arith.constant 0 : i32
    %c0_i32_0 = arith.constant 0 : i32
    return %arg0, %c0_i32 : i32, i32
  }
  func.func @transform_4(%arg0: i32) -> (i32, i32) {
    %c0_i32 = arith.constant 0 : i32
    %c0_i32_0 = arith.constant 0 : i32
    return %arg0, %c0_i32 : i32, i32
  }
}

</mosaic_0001>

<bundles_post_ra>
// kernel: _quantize_channel.1
= control target key start
LH: loop header
LB: loop body
LE: loop exit
PB: predicated region body
PF: predicated region fallthrough
CT: control target
= control target key end

     0   :  { %10 = vsyncpa [#allocation3], 0  ;;  %s323_s0 = inlined_call_operand.vmem [shape: f32[8], index: 0, kind: input, shape index: {}]   ;;  %s324_s1 = inlined_call_operand.vmem [shape: f32[16,128], index: 1, kind: input, shape index: {}]   ;;  %s325_s2 = inlined_call_operand.vmem [shape: s32[16,128], index: 2, kind: input, shape index: {}]   ;;  %s326_s3 = inlined_call_operand.vmem [shape: f32[16,128], index: 3, kind: output, shape index: {0}]   ;;  %s327_s4 = inlined_call_operand.vmem [shape: f32[16,128], index: 4, kind: output, shape index: {1}]  }
   0x1   :  { %s17_s17 = sshll.u32 %s323_s0, 4  ;;  %s18_s17 = int_to_ptr.vmem [resolvable:$true] %s17_s17 }
   0x2   :  { %s179_s18 = scalar_lea.vmem %s18_s17, 16  ;;  %p184_p1 = scmp.lt.s32.totalorder %s18_s17, %s18_s17 }
   0x3   :  { %p180_p0 = scmp.ne.s32.totalorder %s18_s17, %s179_s18  ;;  %p185_p2 = scmp.lt.s32.totalorder %s179_s18, %s179_s18 }
   0x5   :  { %p186_p3 = por %p185_p2, %p184_p1 }
   0x7   :  { %p187_p4 = pnand %p186_p3, %p180_p0 }
   0x9   :  { %190 = shalt.err (!%p187_p4)
}
   0xa   :  { %s193_s19 = smov [#allocation2]  }
   0xb   :  { %20 = dma.vmem_to_smem %s18_s17, 16, %s193_s19, [#allocation3]  }
   0xc   :  { %191 = dma.done.wait [#allocation3], 16  }
   0xd   :  { %192 = vsyncadd [#allocation3], 4294967280 }
   0xe   :  { %28 = sfence }
   0xf   :  { %s31_s20 = sld [smem:[#allocation2]]  ;;  %s170_s21 = sld [smem:[#allocation2 + $0x1]]  ;;  %v226_v0 = vld [vmem:[%s324_s1] sm:$0xff]  ;;  %v231_v1 = vld [vmem:[%s324_s1 + $0x8] sm:$0xff]  ;;  %v194_v24 = vmov 0  }
  0x10   :  { %s171_s22 = sld [smem:[#allocation2 + $0x2]]  ;;  %s172_s23 = sld [smem:[#allocation2 + $0x3]] }
  0x11   :  { %s173_s24 = sld [smem:[#allocation2 + $0x4]]  ;;  %s174_s25 = sld [smem:[#allocation2 + $0x5]] }
  0x12   :  { %s265_s1 = sld [smem:[#allocation2 + $0x6]]  ;;  %s267_s29 = sld [smem:[#allocation2 + $0x7]] }
  0x15   :  { %v233_v2 = vstv %s31_s20  ;;  %v235_v3 = vstv %s170_s21 }
  0x16   :  { %v33_v4 = vsub.f32 %v226_v0, %v233_v2  ;;  %v34_v5 = vsub.f32 %v231_v1, %v233_v2  ;;  %v39_v6 = vsub.f32 %v226_v0, %v235_v3  ;;  %v40_v7 = vsub.f32 %v231_v1, %v235_v3 }
  0x17   :  { %v245_v8 = vstv %s171_s22  ;;  %v247_v9 = vstv %s172_s23  ;;  %v249_v10 = vstv %s173_s24  ;;  %v251_v11 = vstv %s174_s25 }
  0x18   :  { %v35_v12 = vand.u32 2147483647, %v33_v4  ;;  %v36_v13 = vand.u32 2147483647, %v34_v5  ;;  %v41_v14 = vand.u32 2147483647, %v39_v6  ;;  %v51_v15 = vsub.f32 %v226_v0, %v245_v8 }
  0x19   :  { %v42_v16 = vand.u32 2147483647, %v40_v7  ;;  %v52_v17 = vsub.f32 %v231_v1, %v245_v8  ;;  %v63_v18 = vsub.f32 %v226_v0, %v247_v9  ;;  %v64_v19 = vsub.f32 %v231_v1, %v247_v9 }
  0x1a   :  { %vm43_vm0 = vcmp.lt.f32.partialorder %v41_v14, %v35_v12  ;;  %v53_v20 = vand.u32 2147483647, %v51_v15  ;;  %v75_v21 = vsub.f32 %v226_v0, %v249_v10  ;;  %v76_v22 = vsub.f32 %v231_v1, %v249_v10 }
  0x1b   :  { %vm44_vm1 = vcmp.lt.f32.partialorder %v42_v16, %v36_v13  ;;  %v45_v23 = vsel %vm43_vm0, %v41_v14, %v35_v12  ;;  %v47_v25 = vsel %vm43_vm0, 1, %v194_v24  ;;  %v54_v26 = vand.u32 2147483647, %v52_v17 }
  0x1c   :  { %v46_v27 = vsel %vm44_vm1, %v42_v16, %v36_v13  ;;  %v48_v28 = vsel %vm44_vm1, 1, %v194_v24  ;;  %vm55_vm2 = vcmp.lt.f32.partialorder %v53_v20, %v45_v23  ;;  %v65_v29 = vand.u32 2147483647, %v63_v18 }
  0x1d   :  { %vm56_vm3 = vcmp.lt.f32.partialorder %v54_v26, %v46_v27  ;;  %v57_v30 = vsel %vm55_vm2, %v53_v20, %v45_v23  ;;  %v59_v31 = vsel %vm55_vm2, 2, %v47_v25  ;;  %v66_v32 = vand.u32 2147483647, %v64_v19 }
  0x1e   :  { %v58_v33 = vsel %vm56_vm3, %v54_v26, %v46_v27  ;;  %v60_v34 = vsel %vm56_vm3, 2, %v48_v28  ;;  %vm67_vm4 = vcmp.lt.f32.partialorder %v65_v29, %v57_v30  ;;  %v77_v35 = vand.u32 2147483647, %v75_v21 }
  0x1f   :  { %vm68_vm5 = vcmp.lt.f32.partialorder %v66_v32, %v58_v33  ;;  %v69_v36 = vsel %vm67_vm4, %v65_v29, %v57_v30  ;;  %v71_v37 = vsel %vm67_vm4, 3, %v59_v31  ;;  %v78_v38 = vand.u32 2147483647, %v76_v22 }
  0x20   :  { %v70_v39 = vsel %vm68_vm5, %v66_v32, %v58_v33  ;;  %v72_v40 = vsel %vm68_vm5, 3, %v60_v34  ;;  %vm79_vm6 = vcmp.lt.f32.partialorder %v77_v35, %v69_v36  ;;  %v87_v41 = vsub.f32 %v226_v0, %v251_v11 }
  0x21   :  { %vm80_vm7 = vcmp.lt.f32.partialorder %v78_v38, %v70_v39  ;;  %v81_v42 = vsel %vm79_vm6, %v77_v35, %v69_v36  ;;  %v83_v43 = vsel %vm79_vm6, 4, %v71_v37  ;;  %v88_v44 = vsub.f32 %v231_v1, %v251_v11 }
  0x22   :  { %v82_v45 = vsel %vm80_vm7, %v78_v38, %v70_v39  ;;  %v84_v46 = vsel %vm80_vm7, 4, %v72_v40  ;;  %v89_v47 = vand.u32 2147483647, %v87_v41  ;;  %v274_v48 = vstv %s265_s1 }
  0x23   :  { %v90_v49 = vand.u32 2147483647, %v88_v44  ;;  %v99_v50 = vsub.f32 %v226_v0, %v274_v48  ;;  %v100_v51 = vsub.f32 %v231_v1, %v274_v48  ;;  %v281_v52 = vstv %s267_s29 }
  0x24   :  { %vm91_vm8 = vcmp.lt.f32.partialorder %v89_v47, %v81_v42  ;;  %v111_v53 = vsub.f32 %v226_v0, %v281_v52  ;;  %v112_v54 = vsub.f32 %v231_v1, %v281_v52  ;;  %v119_v0 = vld [vmem:[%s325_s2] sm:$0xff]  ;;  %v120_v1 = vld [vmem:[%s325_s2 + $0x8] sm:$0xff] }
  0x25   :  { %vm92_vm9 = vcmp.lt.f32.partialorder %v90_v49, %v82_v45  ;;  %v93_v55 = vsel %vm91_vm8, %v89_v47, %v81_v42  ;;  %v95_v56 = vsel %vm91_vm8, 5, %v83_v43  ;;  %v101_v57 = vand.u32 2147483647, %v99_v50 }
  0x26   :  { %v94_v58 = vsel %vm92_vm9, %v90_v49, %v82_v45  ;;  %v96_v59 = vsel %vm92_vm9, 5, %v84_v46  ;;  %v102_v60 = vand.u32 2147483647, %v100_v51  ;;  %v113_v61 = vand.u32 2147483647, %v111_v53 }
  0x27   :  { %vm103_vm10 = vcmp.lt.f32.partialorder %v101_v57, %v93_v55  ;;  %v114_v62 = vand.u32 2147483647, %v112_v54 }
  0x28   :  { %vm104_vm11 = vcmp.lt.f32.partialorder %v102_v60, %v94_v58  ;;  %v105_v63 = vsel %vm103_vm10, %v101_v57, %v93_v55  ;;  %v107_v4 = vsel %vm103_vm10, 6, %v95_v56 }
  0x29   :  { %v106_v5 = vsel %vm104_vm11, %v102_v60, %v94_v58  ;;  %v108_v6 = vsel %vm104_vm11, 6, %v96_v59  ;;  %vm115_vm12 = vcmp.lt.f32.partialorder %v113_v61, %v105_v63 }
  0x2a   :  { %vm116_vm13 = vcmp.lt.f32.partialorder %v114_v62, %v106_v5  ;;  %v117_v7 = vsel %vm115_vm12, 7, %v107_v4 }
  0x2b   :  { %v118_v12 = vsel %vm116_vm13, 7, %v108_v6  ;;  %v121_v13 = vxor.u32 %v119_v0, %v117_v7 }
  0x2c   :  { %v122_v14 = vxor.u32 %v120_v1, %v118_v12 }
  0x2d   :  { %vm123_vm14 = vcmp.eq.s32.totalorder %v121_v13, 0  ;;  %vm127_vm15 = vcmp.eq.s32.totalorder %v121_v13, 1  ;;  %vm131_vm0 = vcmp.eq.s32.totalorder %v121_v13, 2  ;;  %vm135_vm1 = vcmp.eq.s32.totalorder %v121_v13, 3 }
  0x2e   :  { %v125_v15 = vsel %vm123_vm14, %v233_v2, 0.0  ;;  %vm139_vm2 = vcmp.eq.s32.totalorder %v121_v13, 4  ;;  %vm143_vm3 = vcmp.eq.s32.totalorder %v121_v13, 5  ;;  %vm147_vm4 = vcmp.eq.s32.totalorder %v121_v13, 6 }
  0x2f   :  { %v129_v16 = vsel %vm127_vm15, %v235_v3, %v125_v15  ;;  %vm124_vm5 = vcmp.eq.s32.totalorder %v122_v14, 0  ;;  %vm128_vm6 = vcmp.eq.s32.totalorder %v122_v14, 1  ;;  %vm132_vm7 = vcmp.eq.s32.totalorder %v122_v14, 2 }
  0x30   :  { %v133_v17 = vsel %vm131_vm0, %v245_v8, %v129_v16  ;;  %v126_v18 = vsel %vm124_vm5, %v233_v2, 0.0  ;;  %vm136_vm8 = vcmp.eq.s32.totalorder %v122_v14, 3  ;;  %vm151_vm9 = vcmp.eq.s32.totalorder %v121_v13, 7 }
  0x31   :  { %v137_v19 = vsel %vm135_vm1, %v247_v9, %v133_v17  ;;  %v130_v20 = vsel %vm128_vm6, %v235_v3, %v126_v18  ;;  %vm140_vm10 = vcmp.eq.s32.totalorder %v122_v14, 4  ;;  %vm144_vm11 = vcmp.eq.s32.totalorder %v122_v14, 5 }
  0x32   :  { %v141_v21 = vsel %vm139_vm2, %v249_v10, %v137_v19  ;;  %v134_v22 = vsel %vm132_vm7, %v245_v8, %v130_v20  ;;  %vm148_vm12 = vcmp.eq.s32.totalorder %v122_v14, 6  ;;  %v157_v2 = vcvt.s32.f32 %v121_v13 }
  0x33   :  { %v145_v23 = vsel %vm143_vm3, %v251_v11, %v141_v21  ;;  %v138_v24 = vsel %vm136_vm8, %v247_v9, %v134_v22  ;;  %v158_v25 = vcvt.s32.f32 %v122_v14  ;;  %vm152_vm13 = vcmp.eq.s32.totalorder %v122_v14, 7 }
  0x34   :  { %v149_v26 = vsel %vm147_vm4, %v274_v48, %v145_v23  ;;  %v142_v27 = vsel %vm140_vm10, %v249_v10, %v138_v24  ;;  %159 = vst [vmem:[%s327_s4] sm:$0xff] %v157_v2 }
  0x35   :  { %v153_v3 = vsel %vm151_vm9, %v281_v52, %v149_v26  ;;  %v146_v28 = vsel %vm144_vm11, %v251_v11, %v142_v27  ;;  %160 = vst [vmem:[%s327_s4 + $0x8] sm:$0xff] %v158_v25 }
  0x36   :  { %155 = vst [vmem:[%s326_s3] sm:$0xff] %v153_v3  ;;  %v150_v8 = vsel %vm148_vm12, %v274_v48, %v146_v28 }
  0x37   :  { %v154_v9 = vsel %vm152_vm13, %v281_v52, %v150_v8 }
  0x38   :  { %156 = vst [vmem:[%s326_s3 + $0x8] sm:$0xff] %v154_v9 }
  0x39   :  { %169 = vsyncpa [#allocation3], 1 }

</bundles_post_ra>
